<compile_context>
chip_gen: v7x
topology: tpu7x:2x2x1
jax: 0.10.0
libtpu: 0.0.40
codegen_flags: <defaults>
</compile_context>

<pallas_src>
import functools

import jax
import jax.numpy as jnp
from jax.experimental import pallas as pl
from jax.experimental.pallas import tpu as pltpu


def _cdiv(a, b):
    return -(-a // b)


def _round_up(x, m):
    return _cdiv(x, m) * m


def _vmem_capacity_bytes() -> int:
    """Physical VMEM per TensorCore; conservative (v7x) default if query fails."""
    try:
        cap = int(pltpu.get_tpu_info().vmem_capacity_bytes)
        if cap > 0:
            return cap
    except Exception:
        pass
    return 64 << 20


def _num_tensorcores(default: int = 2) -> int:
    """Best-effort TensorCores-per-chip (v7x: 2, v5e/v6e: 1); safe default 2."""
    try:
        info = pltpu.get_tpu_info()
    except Exception:
        return default
    for attr in ("num_tensorcores", "tensorcores_per_chip", "num_cores",
                 "core_count"):
        v = getattr(info, attr, None)
        if isinstance(v, int) and 0 < v <= 8:
            return v
    return default


def _pick_lane_width(n: int, last_dim: int) -> int:
    """Largest 128-multiple divisor of n (bounded) -> free lane-dense reshape.

    Falls back to the natural last dim (e.g. 180, padded to 256 lanes in VMEM)
    when no 128-multiple divisor exists; the HBM side stays contiguous either
    way, so we never pay an extra jnp.pad pass in the wrapper.
    """
    max_w = min(8192, n // 8)            # keep at least 8 rows
    cand = (max_w // 128) * 128
    while cand >= 128:
        if n % cand == 0:
            return cand
        cand -= 128
    return last_dim


def _l1_partial_kernel(a_ref, b_ref, o_ref, *, tm, k_steps, nb, valid_rows,
                       needs_mask):
    """Accumulate vreg-shaped partial sums of |a - b| into the output block."""
    p = pl.program_id(0)   # parallel (row-range) axis
    k = pl.program_id(1)   # reduction axis

    @pl.when(k == 0)
    def _init():
        o_ref[...] = jnp.zeros_like(o_ref)

    a = a_ref[...]
    b = b_ref[...]
    if a.dtype == jnp.bfloat16:
        # Native bf16 sub/abs (bf16 VALU on v6e/v7x); upcast only to accumulate.
        d = jnp.abs(a - b).astype(jnp.float32)
    else:
        d = jnp.abs(a.astype(jnp.float32) - b.astype(jnp.float32))

    w = d.shape[-1]

    def _accum(x):
        if tm % 8 == 0:
            # (tm, W) -> (tm//8, 8, W): summing the leading axis splits whole
            # sublane groups, so it is element-wise VPU adds only (no XLU).
            o_ref[...] += jnp.sum(x.reshape(tm // 8, 8, w), axis=0)
        else:
            o_ref[...] += x            # tiny-input case (block == full rows)

    if needs_mask:                     # static Python branch
        blk = p * k_steps + k          # logical block index
        # Only the (possibly partial) last valid block and clamped duplicate
        # blocks (blk >= nb) can contain rows past the logical end; everything
        # else takes the unmasked fast path.

        @pl.when(blk < nb - 1)
        def _fast():
            _accum(d)

        @pl.when(blk >= nb - 1)
        def _masked():
            row0 = blk * tm
            rid = jax.lax.broadcasted_iota(jnp.int32, d.shape, 0) + row0
            _accum(jnp.where(rid < valid_rows, d, 0.0))
    else:
        _accum(d)


def mask_loss(input_seq: jax.Array, output_seq: jax.Array, *,
              tile_bytes: int = 8 << 20, num_slices: int | None = None,
              small_input_bytes: int = 1 << 20,
              force_kernel: bool = False) -> jax.Array:
    """L1 (mean absolute error) loss between two equal-shape arrays -> scalar f32."""
    assert input_seq.shape == output_seq.shape
    assert input_seq.dtype == output_seq.dtype
    n = int(input_seq.size)
    itemsize = jnp.dtype(input_seq.dtype).itemsize

    # Tiny-slab fallback: fixed pallas_call/pipeline overhead dominates below
    # ~1 MiB; XLA fuses the elementwise + reduce trivially.
    if not force_kernel and n * itemsize < small_input_bytes:
        return jnp.mean(jnp.abs(input_seq.astype(jnp.float32)
                                - output_seq.astype(jnp.float32)))

    # ---- layout: prefer a *free* reshape to a 128-multiple lane width -------
    lane_w = _pick_lane_width(n, int(input_seq.shape[-1]))
    rows = n // lane_w
    a2 = input_seq.reshape(rows, lane_w)
    b2 = output_seq.reshape(rows, lane_w)

    # Sublane alignment matched to the packed dtype tile: f32->8, bf16->16, i8->32.
    sub = max(8, 32 // itemsize)
    if rows >= sub:
        align = sub
    elif rows >= 8:
        align = 8
    else:
        align = None

    wp = _round_up(lane_w, 128)                    # lane padding inside VMEM
    vmem_cap = (_vmem_capacity_bytes() * 3) // 4   # headroom for Mosaic scratch

    # ---- row tile: bounded by tile_bytes AND by the VMEM budget --------------
    if align is not None:
        budget_rows = max(align,
                          (tile_bytes // (lane_w * itemsize)) // align * align)
        # 2 inputs x 2 pipeline buffers + ~3 tile-sized f32 temporaries.
        per_row_vmem = 2 * 2 * wp * itemsize + 3 * wp * 4
        vmem_rows = max(align,
                        (int(vmem_cap * 0.7) // per_row_vmem) // align * align)
        tm = int(min(budget_rows, vmem_rows, (rows // align) * align))
    else:
        tm = rows                                   # block == full rows (tiny)

    nb = _cdiv(rows, tm)                            # number of valid row blocks
    if num_slices is None:
        num_slices = _num_tensorcores()
    p_slices = max(1, min(num_slices, nb))
    k_steps = _cdiv(nb, p_slices)
    needs_mask = (p_slices * k_steps * tm) != rows

    out_rows = 8 if tm % 8 == 0 else tm

    vmem_need = (2 * 2 * tm * wp * itemsize         # input pipeline buffers
                 + 3 * tm * wp * 4                  # in-kernel f32 temporaries
                 + 2 * out_rows * wp * 4)           # resident output block
    vmem_limit = int(min(max(2 * vmem_need, 16 << 20), vmem_cap))

    kernel = functools.partial(
        _l1_partial_kernel,
        tm=tm, k_steps=k_steps, nb=nb, valid_rows=rows, needs_mask=needs_mask)

    def in_map(p, k):
        blk = p * k_steps + k
        # Clamp logical blocks past the end onto the last valid block; their
        # contribution is zeroed by the in-kernel row mask (blk >= nb-1 path).
        return (jnp.minimum(blk, nb - 1), 0)

    partials_bytes = p_slices * out_rows * lane_w * 4
    cost = pl.CostEstimate(flops=3 * n, transcendentals=0,
                           bytes_accessed=2 * n * itemsize + partials_bytes)

    partials = pl.pallas_call(
        kernel,
        out_shape=jax.ShapeDtypeStruct((p_slices * out_rows, lane_w),
                                       jnp.float32),
        grid_spec=pltpu.PrefetchScalarGridSpec(
            num_scalar_prefetch=0,
            grid=(p_slices, k_steps),
            in_specs=[
                pl.BlockSpec((tm, lane_w), in_map),
                pl.BlockSpec((tm, lane_w), in_map),
            ],
            out_specs=pl.BlockSpec((out_rows, lane_w), lambda p, k: (p, 0)),
        ),
        compiler_params=pltpu.CompilerParams(
            dimension_semantics=("parallel", "arbitrary"),
            vmem_limit_bytes=vmem_limit,
        ),
        cost_estimate=cost,
    )(a2, b2)

    # Single tiny cross-lane reduce; divide by the TRUE element count.
    return jnp.sum(partials) / jnp.float32(n)


if __name__ == "__main__":
    key = jax.random.PRNGKey(0)
    k1, k2, k3, k4, k5, k6 = jax.random.split(key, 6)

    # Shape consistent with the module docstring: [batch, timelength, 180].
    B, T, D = 2, 8, 180
    a = jax.random.normal(k1, (B, T, D), dtype=jnp.float32)
    b = jax.random.normal(k2, (B, T, D), dtype=jnp.float32)
    ref = jnp.mean(jnp.abs(a - b))

    # 1) Pallas kernel path (forced; the tiny-input fallback would otherwise
    #    take over at this size).
    loss = jax.block_until_ready(mask_loss(a, b, force_kernel=True))
    assert jnp.allclose(loss, ref, rtol=1e-5, atol=1e-6), (loss, ref)

    # 2) Default tiny-input fallback path.
    loss_fb = jax.block_until_ready(mask_loss(a, b))
    assert jnp.allclose(loss_fb, ref, rtol=1e-5, atol=1e-6), (loss_fb, ref)

    # 3) Non-divisible rows -> partial last block + clamped duplicate blocks
    #    (masked accumulate) on the padded-lane (180-wide) layout.
    a2 = jax.random.normal(k3, (2, 49, D), dtype=jnp.float32)
    b2 = jax.random.normal(k4, (2, 49, D), dtype=jnp.float32)
    loss2 = jax.block_until_ready(mask_loss(a2, b2, force_kernel=True))
    ref2 = jnp.mean(jnp.abs(a2 - b2))
    assert jnp.allclose(loss2, ref2, rtol=1e-5, atol=1e-6), (loss2, ref2)

    # 4) Element count divisible by 128 -> free lane-dense reshape path
    #    (2*32*180 = 11520 -> lane width 1280) with mask + parallel slices.
    a3 = jax.random.normal(k5, (2, 32, D), dtype=jnp.float32)
    b3 = jax.random.normal(k6, (2, 32, D), dtype=jnp.float32)
    loss3 = jax.block_until_ready(mask_loss(a3, b3, force_kernel=True))
    ref3 = jnp.mean(jnp.abs(a3 - b3))
    assert jnp.allclose(loss3, ref3, rtol=1e-5, atol=1e-6), (loss3, ref3)

    # TODO(synk): requires_grad_/retain_grad in the PyTorch module are autograd
    # bookkeeping with no forward-pass equivalent; omitted.
    print("KERNEL_OK")
</pallas_src>

<mosaic_0001>
module attributes {stable_mosaic.version = 11 : i64} {
  func.func @_l1_partial_kernel(%arg0: i32, %arg1: i32, %arg2: memref<16x180xf32, #tpu.memory_space<vmem>>, %arg3: memref<16x180xf32, #tpu.memory_space<vmem>>, %arg4: memref<8x180xf32, #tpu.memory_space<vmem>>) attributes {dimension_semantics = [#tpu.dimension_semantics<parallel>, #tpu.dimension_semantics<arbitrary>], iteration_bounds = array<i64: 1, 1>, scalar_prefetch = 0 : i64, scratch_operands = 0 : i64, tpu.core_type = #tpu.core_type<tc>, window_params = [{transform_indices = @transform_0, window_bounds = array<i64: 16, 180>}, {transform_indices = @transform_1, window_bounds = array<i64: 16, 180>}, {transform_indices = @transform_2, window_bounds = array<i64: 8, 180>}]} {
    %c0_i32 = arith.constant 0 : i32
    %0 = arith.cmpi eq, %arg1, %c0_i32 : i32
    %1 = arith.extui %0 : i1 to i32
    %c0_i32_0 = arith.constant 0 : i32
    %2 = arith.cmpi ne, %1, %c0_i32_0 : i32
    scf.if %2 {
      %cst_8 = arith.constant 0.000000e+00 : f32
      %12 = vector.broadcast %cst_8 : f32 to vector<8x180xf32>
      %c0_9 = arith.constant 0 : index
      %c0_10 = arith.constant 0 : index
      %13 = vector.load %arg4[%c0_9, %c0_10] : memref<8x180xf32, #tpu.memory_space<vmem>>, vector<8x180xf32>
      tpu.vector_store %arg4[%c0_9, %c0_10], %12 {strides = array<i32>} : memref<8x180xf32, #tpu.memory_space<vmem>>, vector<8x180xf32>,
    } else {
    }
    %c0 = arith.constant 0 : index
    %c0_1 = arith.constant 0 : index
    %3 = vector.load %arg2[%c0, %c0_1] : memref<16x180xf32, #tpu.memory_space<vmem>>, vector<16x180xf32>
    %c0_2 = arith.constant 0 : index
    %c0_3 = arith.constant 0 : index
    %4 = vector.load %arg3[%c0_2, %c0_3] : memref<16x180xf32, #tpu.memory_space<vmem>>, vector<16x180xf32>
    %5 = arith.subf %3, %4 : vector<16x180xf32>
    %6 = math.absf %5 : vector<16x180xf32>
    %c0_4 = arith.constant 0 : index
    %c0_5 = arith.constant 0 : index
    %7 = vector.load %arg4[%c0_4, %c0_5] : memref<8x180xf32, #tpu.memory_space<vmem>>, vector<8x180xf32>
    %8 = vector.shape_cast %6 : vector<16x180xf32> to vector<2x8x180xf32>
    %cst = arith.constant dense<0.000000e+00> : vector<8x180xf32>
    %9 = vector.multi_reduction <add>, %8, %cst [0] : vector<2x8x180xf32> to vector<8x180xf32>
    %10 = arith.addf %7, %9 : vector<8x180xf32>
    %c0_6 = arith.constant 0 : index
    %c0_7 = arith.constant 0 : index
    %11 = vector.load %arg4[%c0_6, %c0_7] : memref<8x180xf32, #tpu.memory_space<vmem>>, vector<8x180xf32>
    tpu.vector_store %arg4[%c0_6, %c0_7], %10 {strides = array<i32>} : memref<8x180xf32, #tpu.memory_space<vmem>>, vector<8x180xf32>,
    return
  }
  func.func @transform_0(%arg0: i32, %arg1: i32) -> (i32, i32) {
    %c1_i32 = arith.constant 1 : i32
    %0 = arith.muli %arg0, %c1_i32 : i32
    %1 = arith.addi %0, %arg1 : i32
    %c0_i32 = arith.constant 0 : i32
    %2 = arith.minsi %1, %c0_i32 : i32
    %c0_i32_0 = arith.constant 0 : i32
    %c0_i32_1 = arith.constant 0 : i32
    return %2, %c0_i32_0 : i32, i32
  }
  func.func @transform_1(%arg0: i32, %arg1: i32) -> (i32, i32) {
    %c1_i32 = arith.constant 1 : i32
    %0 = arith.muli %arg0, %c1_i32 : i32
    %1 = arith.addi %0, %arg1 : i32
    %c0_i32 = arith.constant 0 : i32
    %2 = arith.minsi %1, %c0_i32 : i32
    %c0_i32_0 = arith.constant 0 : i32
    %c0_i32_1 = arith.constant 0 : i32
    return %2, %c0_i32_0 : i32, i32
  }
  func.func @transform_2(%arg0: i32, %arg1: i32) -> (i32, i32) {
    %c0_i32 = arith.constant 0 : i32
    %c0_i32_0 = arith.constant 0 : i32
    return %arg0, %c0_i32 : i32, i32
  }
}

</mosaic_0001>

<bundles_post_ra>
// kernel: tpu_custom_call.1
= control target key start
LH: loop header
LB: loop body
LE: loop exit
PB: predicated region body
PF: predicated region fallthrough
CT: control target
= control target key end

     0   :  { %7 = vsyncpa [#allocation3], 0  ;;  %s255_s0 = inlined_call_operand.hbm [shape: f32[16,180], index: 0, kind: input, shape index: {}]   ;;  %s256_s1 = inlined_call_operand.hbm [shape: f32[16,180], index: 1, kind: input, shape index: {}]   ;;  %s257_s2 = inlined_call_operand.hbm [shape: f32[8,180], index: 2, kind: output, shape index: {}]  }
   0x1   :  { %8 = vsyncpa [#allocation6], 0 }
   0x2   :  { %9 = vsyncpa [#allocation4], 0  ;;  %s194_s9 = smov [#allocation2]   ;;  %s122_s13 = scalar_lea.hbm %s255_s0, 512 }
   0x3   :  { %s22_s10 = sshll.u32 %s194_s9, 4  ;;  %p123_p0 = scmp.ne.s32.totalorder %s255_s0, %s122_s13  ;;  %s23_s10 = int_to_ptr.vmem [resolvable:$true] %s22_s10 }
   0x4   :  { %p126_p1 = scmp.lt.u32.totalorder %s122_s13, %s255_s0 }
   0x6   :  { %p128_p2 = pnand %p126_p1, %p123_p0 }
   0x8   :  { %131 = shalt.err (!%p128_p2)
}
   0x9   :  { %s132_s18 = scalar_lea.vmem %s23_s10, 512  ;;  %p137_p4 = scmp.lt.s32.totalorder %s23_s10, %s23_s10 }
   0xa   :  { %p133_p3 = scmp.ne.s32.totalorder %s23_s10, %s132_s18  ;;  %p138_p5 = scmp.lt.s32.totalorder %s132_s18, %s132_s18 }
   0xc   :  { %p139_p6 = por %p138_p5, %p137_p4 }
   0xe   :  { %p140_p7 = pnand %p139_p6, %p133_p3 }
  0x10   :  { %143 = shalt.err (!%p140_p7)
}
  0x11   :  { %s195_s19 = smov 256   ;;  %s196_s20 = smov 16  }
  0x12   :  { %28 = dma.hbm_to_vmem [thread:$0]  %s255_s0, 512, %s23_s10, [#allocation3], %s195_s19, %s195_s19, %s196_s20  }
  0x13   :  { %s197_s23 = smov [#allocation5]   ;;  %s144_s27 = scalar_lea.hbm %s256_s1, 512 }
  0x14   :  { %s41_s24 = sshll.u32 %s197_s23, 4  ;;  %p145_p8 = scmp.ne.s32.totalorder %s256_s1, %s144_s27  ;;  %s42_s24 = int_to_ptr.vmem [resolvable:$true] %s41_s24 }
  0x15   :  { %p148_p9 = scmp.lt.u32.totalorder %s144_s27, %s256_s1 }
  0x17   :  { %p150_p10 = pnand %p148_p9, %p145_p8 }
  0x19   :  { %153 = shalt.err (!%p150_p10)
}
  0x1a   :  { %s154_s4 = scalar_lea.vmem %s42_s24, 512  ;;  %p159_p12 = scmp.lt.s32.totalorder %s42_s24, %s42_s24 }
  0x1b   :  { %p155_p11 = scmp.ne.s32.totalorder %s42_s24, %s154_s4  ;;  %p160_p13 = scmp.lt.s32.totalorder %s154_s4, %s154_s4 }
  0x1d   :  { %p161_p0 = por %p160_p13, %p159_p12 }
  0x1f   :  { %p162_p1 = pnand %p161_p0, %p155_p11 }
  0x21   :  { %165 = shalt.err (!%p162_p1)
}
  0x22   :  { %47 = dma.hbm_to_vmem [thread:$0]  %s256_s1, 512, %s42_s24, [#allocation6], %s195_s19, %s195_s19, %s196_s20  }
  0x23   :  { %188 = dma.done.wait [#allocation3], 512  }
  0x24   :  { %189 = vsyncadd [#allocation3], 4294966784 }
  0x25   :  { %190 = dma.done.wait [#allocation6], 512  }
  0x26   :  { %191 = vsyncadd [#allocation6], 4294966784  ;;  %vm67_vm0 = vcmask 424960   ;;  %v198_v0 = vmov 0.0   ;;  %v70_v1 = vld [vmem:[#allocation2 + $0x8] sm:$0xff]  ;;  %v72_v2 = vld [vmem:[#allocation2 + $0x18] sm:$0xff] }
  0x27   :  { %68 = vst.msk [vmem:[#allocation7 + $0x8] sm:$0xff] %vm67_vm0, %v198_v0  ;;  %v74_v3 = vld [vmem:[#allocation5 + $0x8] sm:$0xff]  ;;  %v76_v4 = vld [vmem:[#allocation5 + $0x18] sm:$0xff]  ;;  %v69_v6 = vld [vmem:[#allocation2] sm:$0xff]  ;;  %s199_s1 = smov [#allocation7]  }
  0x28   :  { %v78_v5 = vsub.f32 %v70_v1, %v74_v3  ;;  %v71_v7 = vld [vmem:[#allocation2 + $0x10] sm:$0xff]  ;;  %v80_v8 = vsub.f32 %v72_v2, %v76_v4  ;;  %v73_v9 = vld [vmem:[#allocation5] sm:$0xff]  ;;  %s102_s6 = sshll.u32 %s199_s1, 4  ;;  %s103_s6 = int_to_ptr.vmem [resolvable:$true] %s102_s6 }
  0x29   :  { %v75_v10 = vld [vmem:[#allocation5 + $0x10] sm:$0xff]  ;;  %v77_v12 = vsub.f32 %v69_v6, %v73_v9  ;;  %s166_s7 = scalar_lea.vmem %s103_s6, 256  ;;  %p171_p3 = scmp.lt.s32.totalorder %s103_s6, %s103_s6 }
  0x2a   :  { %v82_v11 = vand.u32 2147483647, %v78_v5  ;;  %v79_v13 = vsub.f32 %v71_v7, %v75_v10  ;;  %v84_v14 = vand.u32 2147483647, %v80_v8  ;;  %p167_p2 = scmp.ne.s32.totalorder %s103_s6, %s166_s7  ;;  %p172_p4 = scmp.lt.s32.totalorder %s166_s7, %s166_s7 }
  0x2b   :  { %v81_v16 = vand.u32 2147483647, %v77_v12 }
  0x2c   :  { %v89_v15 = vsel %vm67_vm0, %v82_v11, 0.0  ;;  %v83_v17 = vand.u32 2147483647, %v79_v13  ;;  %v90_v18 = vsel %vm67_vm0, %v84_v14, 0.0  ;;  %p173_p5 = por %p172_p4, %p171_p3 }
  0x2d   :  { %v91_v20 = vadd.f32 %v90_v18, %v89_v15 }
  0x2e   :  { %v86_v19 = vld [vmem:[#allocation7 + $0x8] sm:$0xff]  ;;  %v87_v21 = vadd.f32 %v83_v17, %v81_v16  ;;  %p174_p6 = pnand %p173_p5, %p167_p2 }
  0x2f   :  { %v93_v22 = vadd.f32 %v91_v20, %v86_v19 }
  0x30   :  { %94 = vst [vmem:[#allocation7] sm:$0xff] %v87_v21 }
  0x31   :  { %95 = vst.msk [vmem:[#allocation7 + $0x8] sm:$0xff] %vm67_vm0, %v93_v22 }
  0x32   :  { %177 = shalt.err (!%p174_p6)
}
  0x33   :  { %s178_s10 = scalar_lea.hbm %s257_s2, 256 }
  0x34   :  { %p179_p7 = scmp.ne.s32.totalorder %s257_s2, %s178_s10  ;;  %p182_p8 = scmp.lt.u32.totalorder %s178_s10, %s257_s2 }
  0x36   :  { %p184_p9 = pnand %p182_p8, %p179_p7 }
  0x38   :  { %187 = shalt.err (!%p184_p9)
}
  0x39   :  { %105 = dma.vmem_to_hbm [thread:$0]  %s103_s6, 256, %s257_s2, [#allocation4]  }
  0x3a   :  { %192 = dma.done.wait [#allocation4], 256  }
  0x3b   :  { %193 = vsyncadd [#allocation4], 4294967040 }
  0x3c   :  { %109 = vsyncpa [#allocation3], 1 }
  0x3d   :  { %110 = vsyncpa [#allocation6], 1 }
  0x3e   :  { %111 = vsyncpa [#allocation4], 1 }

</bundles_post_ra>
